<compile_context>
chip_gen: v7x
topology: tpu7x:2x2x1
jax: 0.10.0
libtpu: 0.0.40
codegen_flags: <defaults>
</compile_context>

<pallas_src>
import functools
import math

import jax
import jax.numpy as jnp
from jax.experimental import pallas as pl
from jax.experimental.pallas import tpu as pltpu


def _round_up(n, m):
    return ((n + m - 1) // m) * m


def _ppo_kernel(x_ref, w1_ref, b1_ref, wh1_ref, bh1_ref, wh2_ref, bh2_ref,
                out_ref, *, outputs_count):
    """One batch tile: trunk + fused heads, written as a single lane-dense slab."""
    x = x_ref[...]

    # ---- shared feature trunk:  ReLU(x @ W1 + b1) ----
    feats = jnp.dot(x, w1_ref[...], preferred_element_type=jnp.float32) + b1_ref[...]
    feats = jnp.maximum(feats, 0.0)

    # ---- fused head layer 1: ReLU(feats @ [Wmu1 | Wvar1 | Wval1] + b) -> (TB, 3*h2) ----
    h = jnp.dot(feats, wh1_ref[...], preferred_element_type=jnp.float32) + bh1_ref[...]
    h = jnp.maximum(h, 0.0)

    # ---- fused head layer 2 (block-diagonal weights): (TB, P) with
    #      cols [0, oc)        -> mu pre-activation
    #      cols [oc, 2*oc)     -> var pre-activation
    #      col  2*oc           -> value
    #      cols > 2*oc         -> zero padding ----
    z = jnp.dot(h, wh2_ref[...], preferred_element_type=jnp.float32) + bh2_ref[...]

    col = jax.lax.broadcasted_iota(jnp.int32, z.shape, 1)
    mu_mask = col < outputs_count
    var_mask = jnp.logical_and(col >= outputs_count, col < 2 * outputs_count)

    # torch Softplus(beta=1, threshold=20): x > 20 -> x else log(1 + exp(x))
    softplus = jnp.where(z > 20.0, z, jnp.log1p(jnp.exp(jnp.minimum(z, 20.0))))
    tanh = jnp.tanh(z)

    out_ref[...] = jnp.where(mu_mask, tanh, jnp.where(var_mask, softplus, z))


# ---------------- one-time fused-weight packing (hoisted out of the per-call path) ----------

def pack_params(params):
    """Pack the 14 per-layer tensors into the fused layout the kernel consumes.

    Call once at init / whenever the parameters change, NOT per forward.
    Returns (packed_tuple, outputs_count).
    """
    (w1, b1, wmu1, bmu1, wmu2, bmu2,
     wvar1, bvar1, wvar2, bvar2, wval1, bval1, wval2, bval2) = params

    h2 = wmu1.shape[1]
    oc = wmu2.shape[1]
    out_total = 2 * oc + 1
    P = _round_up(out_total, 8)          # 9 -> 16; block last dim == full array dim, so OK

    # fused head layer 1: (hidden, 3*h2)
    w_h1 = jnp.concatenate([wmu1, wvar1, wval1], axis=1)
    b_h1 = jnp.concatenate([bmu1, bvar1, bval1], axis=1)

    # fused, block-diagonal head layer 2: (3*h2, P)
    w_h2 = jnp.zeros((3 * h2, P), jnp.float32)
    w_h2 = w_h2.at[0:h2, 0:oc].set(wmu2)
    w_h2 = w_h2.at[h2:2 * h2, oc:2 * oc].set(wvar2)
    w_h2 = w_h2.at[2 * h2:3 * h2, 2 * oc:2 * oc + 1].set(wval2)
    b_h2 = jnp.zeros((1, P), jnp.float32)
    b_h2 = b_h2.at[:, 0:oc].set(bmu2)
    b_h2 = b_h2.at[:, oc:2 * oc].set(bvar2)
    b_h2 = b_h2.at[:, 2 * oc:2 * oc + 1].set(bval2)

    packed = (w1, b1, w_h1, b_h1, w_h2, b_h2)
    return jax.tree_util.tree_map(jax.device_put, packed), oc


# ---------------- forward pass ----------------

@functools.partial(jax.jit, static_argnames=("outputs_count", "block_batch"))
def ppo_forward(x, packed, *, outputs_count, block_batch=4096):
    """Full PPO MLP forward. x: (B, input_dim) float32 -> (mu, var, value)."""
    w1, b1, w_h1, b_h1, w_h2, b_h2 = packed

    B, input_dim = x.shape
    hidden = w1.shape[1]
    h3 = w_h1.shape[1]          # 3 * h2
    P = w_h2.shape[1]
    oc = outputs_count

    # Batch tiling: TB rows per grid step, weights stay VMEM-resident.
    TB = min(block_batch, _round_up(B, 8))
    TB = _round_up(TB, 8)
    grid = (pl.cdiv(B, TB),)    # no wrapper-side padding: Pallas masks the partial last block

    out = pl.pallas_call(
        functools.partial(_ppo_kernel, outputs_count=oc),
        out_shape=jax.ShapeDtypeStruct((B, P), jnp.float32),
        grid_spec=pltpu.PrefetchScalarGridSpec(
            num_scalar_prefetch=0,
            grid=grid,
            in_specs=[
                pl.BlockSpec((TB, input_dim), lambda i: (i, 0)),      # x tile (pipelined)
                pl.BlockSpec((input_dim, hidden), lambda i: (0, 0)),  # W1 (resident)
                pl.BlockSpec((1, hidden), lambda i: (0, 0)),          # b1
                pl.BlockSpec((hidden, h3), lambda i: (0, 0)),         # fused head-1 W
                pl.BlockSpec((1, h3), lambda i: (0, 0)),              # fused head-1 b
                pl.BlockSpec((h3, P), lambda i: (0, 0)),              # block-diag head-2 W
                pl.BlockSpec((1, P), lambda i: (0, 0)),               # head-2 b
            ],
            out_specs=pl.BlockSpec((TB, P), lambda i: (i, 0)),        # lane-dense (B, 16) slab
        ),
        compiler_params=pltpu.CompilerParams(
            dimension_semantics=("parallel",),
            vmem_limit_bytes=48 * 1024 * 1024),
    )(x, w1, b1, w_h1, b_h1, w_h2, b_h2)

    mu = out[:, 0:oc]
    var = out[:, oc:2 * oc]
    value = out[:, 2 * oc:2 * oc + 1]
    return mu, var, value


# ---------------- parameter init (torch-equivalent layout, pre-transposed) ----------------

def _xavier_uniform(key, fan_in, fan_out):
    # torch.nn.init.xavier_uniform_ on a (out, in) weight; stored transposed (in, out).
    bound = math.sqrt(6.0 / (fan_in + fan_out))
    return jax.random.uniform(key, (fan_in, fan_out), jnp.float32, -bound, bound)


def _bias_init(key, fan_in, fan_out):
    # torch default Linear bias init: U(-1/sqrt(fan_in), 1/sqrt(fan_in)); stored as (1, out).
    bound = 1.0 / math.sqrt(fan_in)
    return jax.random.uniform(key, (1, fan_out), jnp.float32, -bound, bound)


def init_params(key, input_dim, outputs_count, hidden_count):
    h2 = hidden_count // 2
    keys = jax.random.split(key, 14)
    w1 = _xavier_uniform(keys[0], input_dim, hidden_count)
    b1 = _bias_init(keys[1], input_dim, hidden_count)
    wmu1 = _xavier_uniform(keys[2], hidden_count, h2)
    bmu1 = _bias_init(keys[3], hidden_count, h2)
    wmu2 = _xavier_uniform(keys[4], h2, outputs_count)
    bmu2 = _bias_init(keys[5], h2, outputs_count)
    wvar1 = _xavier_uniform(keys[6], hidden_count, h2)
    bvar1 = _bias_init(keys[7], hidden_count, h2)
    wvar2 = _xavier_uniform(keys[8], h2, outputs_count)
    bvar2 = _bias_init(keys[9], h2, outputs_count)
    wval1 = _xavier_uniform(keys[10], hidden_count, h2)
    bval1 = _bias_init(keys[11], hidden_count, h2)
    wval2 = _xavier_uniform(keys[12], h2, 1)
    bval2 = _bias_init(keys[13], h2, 1)
    return (w1, b1, wmu1, bmu1, wmu2, bmu2,
            wvar1, bvar1, wvar2, bvar2, wval1, bval1, wval2, bval2)


# ---------------- pure-JAX reference of the original (unfused) module math ----------------

def ref_forward(x, p):
    (w1, b1, wmu1, bmu1, wmu2, bmu2,
     wvar1, bvar1, wvar2, bvar2, wval1, bval1, wval2, bval2) = p
    f = jnp.maximum(x @ w1 + b1, 0.0)
    m = jnp.tanh(jnp.maximum(f @ wmu1 + bmu1, 0.0) @ wmu2 + bmu2)
    zv = jnp.maximum(f @ wvar1 + bvar1, 0.0) @ wvar2 + bvar2
    v = jnp.where(zv > 20.0, zv, jnp.log1p(jnp.exp(jnp.minimum(zv, 20.0))))
    val = jnp.maximum(f @ wval1 + bval1, 0.0) @ wval2 + bval2
    return m, v, val


if __name__ == "__main__":
    # Small shapes consistent with the module: state dim 16, 4 actions, hidden 32.
    input_dim = 16
    outputs_count = 4
    hidden_count = 32

    key = jax.random.PRNGKey(0)
    k_params, k_x1, k_x2, k_x3 = jax.random.split(key, 4)
    params = init_params(k_params, input_dim, outputs_count, hidden_count)
    packed, oc = pack_params(params)          # one-time packing, not per forward

    # --- case 1: tiny batch (single grid step, full blocks) ---
    batch = 8
    x = jax.random.normal(k_x1, (batch, input_dim), jnp.float32)
    mu, var, value = jax.block_until_ready(
        ppo_forward(x, packed, outputs_count=oc))
    mu_r, var_r, val_r = ref_forward(x, params)
    assert mu.shape == (batch, outputs_count)
    assert var.shape == (batch, outputs_count)
    assert value.shape == (batch, 1)
    assert jnp.allclose(mu, mu_r, atol=2e-5)
    assert jnp.allclose(var, var_r, atol=2e-5)
    assert jnp.allclose(value, val_r, atol=2e-5)

    # --- case 2: non-divisible batch exercising the multi-step grid + masked partial block ---
    batch2 = 300
    x2 = jax.random.normal(k_x2, (batch2, input_dim), jnp.float32)
    mu2, var2, value2 = jax.block_until_ready(
        ppo_forward(x2, packed, outputs_count=oc, block_batch=128))
    mu2_r, var2_r, val2_r = ref_forward(x2, params)
    assert mu2.shape == (batch2, outputs_count)
    assert var2.shape == (batch2, outputs_count)
    assert value2.shape == (batch2, 1)
    assert jnp.allclose(mu2, mu2_r, atol=2e-5)
    assert jnp.allclose(var2, var2_r, atol=2e-5)
    assert jnp.allclose(value2, val2_r, atol=2e-5)

    # --- case 3: larger batch on the default (TB=4096) path, with a partial last block ---
    batch3 = 4500
    x3 = jax.random.normal(k_x3, (batch3, input_dim), jnp.float32)
    mu3, var3, value3 = jax.block_until_ready(
        ppo_forward(x3, packed, outputs_count=oc))
    mu3_r, var3_r, val3_r = ref_forward(x3, params)
    assert mu3.shape == (batch3, outputs_count)
    assert var3.shape == (batch3, outputs_count)
    assert value3.shape == (batch3, 1)
    assert jnp.allclose(mu3, mu3_r, atol=2e-5)
    assert jnp.allclose(var3, var3_r, atol=2e-5)
    assert jnp.allclose(value3, val3_r, atol=2e-5)

    print("KERNEL_OK")
</pallas_src>

<mosaic_0001>
module attributes {stable_mosaic.version = 11 : i64} {
  func.func @_ppo_kernel(%arg0: i32, %arg1: memref<8x16xf32, #tpu.memory_space<vmem>>, %arg2: memref<16x32xf32, #tpu.memory_space<vmem>>, %arg3: memref<1x32xf32, #tpu.memory_space<vmem>>, %arg4: memref<32x48xf32, #tpu.memory_space<vmem>>, %arg5: memref<1x48xf32, #tpu.memory_space<vmem>>, %arg6: memref<48x16xf32, #tpu.memory_space<vmem>>, %arg7: memref<1x16xf32, #tpu.memory_space<vmem>>, %arg8: memref<8x16xf32, #tpu.memory_space<vmem>>) attributes {dimension_semantics = [#tpu.dimension_semantics<parallel>], iteration_bounds = array<i64: 1>, scalar_prefetch = 0 : i64, scratch_operands = 0 : i64, tpu.core_type = #tpu.core_type<tc>, window_params = [{transform_indices = @transform_0, window_bounds = array<i64: 8, 16>}, {pipeline_mode = #tpu.pipeline_mode<synchronous>, transform_indices = @transform_1, window_bounds = array<i64: 16, 32>}, {pipeline_mode = #tpu.pipeline_mode<synchronous>, transform_indices = @transform_2, window_bounds = array<i64: 1, 32>}, {pipeline_mode = #tpu.pipeline_mode<synchronous>, transform_indices = @transform_3, window_bounds = array<i64: 32, 48>}, {pipeline_mode = #tpu.pipeline_mode<synchronous>, transform_indices = @transform_4, window_bounds = array<i64: 1, 48>}, {pipeline_mode = #tpu.pipeline_mode<synchronous>, transform_indices = @transform_5, window_bounds = array<i64: 48, 16>}, {pipeline_mode = #tpu.pipeline_mode<synchronous>, transform_indices = @transform_6, window_bounds = array<i64: 1, 16>}, {transform_indices = @transform_7, window_bounds = array<i64: 8, 16>}]} {
    %c0 = arith.constant 0 : index
    %c0_0 = arith.constant 0 : index
    %0 = vector.load %arg1[%c0, %c0_0] : memref<8x16xf32, #tpu.memory_space<vmem>>, vector<8x16xf32>
    %c0_1 = arith.constant 0 : index
    %c0_2 = arith.constant 0 : index
    %1 = vector.load %arg2[%c0_1, %c0_2] : memref<16x32xf32, #tpu.memory_space<vmem>>, vector<16x32xf32>
    %cst = arith.constant dense<0.000000e+00> : vector<8x32xf32>
    %2 = tpu.matmul %0, %1, %cst {dimension_numbers = #tpu.dot_dimension_numbers<[1], [0], [0], [1], [0, 0, 1, 1], [], []>} : vector<8x16xf32>, vector<16x32xf32>, vector<8x32xf32> -> vector<8x32xf32>
    %c0_3 = arith.constant 0 : index
    %c0_4 = arith.constant 0 : index
    %3 = vector.load %arg3[%c0_3, %c0_4] : memref<1x32xf32, #tpu.memory_space<vmem>>, vector<1x32xf32>
    %4 = vector.broadcast %3 : vector<1x32xf32> to vector<8x32xf32>
    %5 = arith.addf %2, %4 : vector<8x32xf32>
    %cst_5 = arith.constant 0.000000e+00 : f32
    %6 = vector.broadcast %cst_5 : f32 to vector<8x32xf32>
    %7 = arith.maximumf %5, %6 : vector<8x32xf32>
    %c0_6 = arith.constant 0 : index
    %c0_7 = arith.constant 0 : index
    %8 = vector.load %arg4[%c0_6, %c0_7] : memref<32x48xf32, #tpu.memory_space<vmem>>, vector<32x48xf32>
    %cst_8 = arith.constant dense<0.000000e+00> : vector<8x48xf32>
    %9 = tpu.matmul %7, %8, %cst_8 {dimension_numbers = #tpu.dot_dimension_numbers<[1], [0], [0], [1], [0, 0, 1, 1], [], []>} : vector<8x32xf32>, vector<32x48xf32>, vector<8x48xf32> -> vector<8x48xf32>
    %c0_9 = arith.constant 0 : index
    %c0_10 = arith.constant 0 : index
    %10 = vector.load %arg5[%c0_9, %c0_10] : memref<1x48xf32, #tpu.memory_space<vmem>>, vector<1x48xf32>
    %11 = vector.broadcast %10 : vector<1x48xf32> to vector<8x48xf32>
    %12 = arith.addf %9, %11 : vector<8x48xf32>
    %cst_11 = arith.constant 0.000000e+00 : f32
    %13 = vector.broadcast %cst_11 : f32 to vector<8x48xf32>
    %14 = arith.maximumf %12, %13 : vector<8x48xf32>
    %c0_12 = arith.constant 0 : index
    %c0_13 = arith.constant 0 : index
    %15 = vector.load %arg6[%c0_12, %c0_13] : memref<48x16xf32, #tpu.memory_space<vmem>>, vector<48x16xf32>
    %cst_14 = arith.constant dense<0.000000e+00> : vector<8x16xf32>
    %16 = tpu.matmul %14, %15, %cst_14 {dimension_numbers = #tpu.dot_dimension_numbers<[1], [0], [0], [1], [0, 0, 1, 1], [], []>} : vector<8x48xf32>, vector<48x16xf32>, vector<8x16xf32> -> vector<8x16xf32>
    %c0_15 = arith.constant 0 : index
    %c0_16 = arith.constant 0 : index
    %17 = vector.load %arg7[%c0_15, %c0_16] : memref<1x16xf32, #tpu.memory_space<vmem>>, vector<1x16xf32>
    %18 = vector.broadcast %17 : vector<1x16xf32> to vector<8x16xf32>
    %19 = arith.addf %16, %18 : vector<8x16xf32>
    %20 = tpu.iota {dimensions = array<i32: 1>} : vector<8x16xi32>
    %c4_i32 = arith.constant 4 : i32
    %21 = vector.broadcast %c4_i32 : i32 to vector<8x16xi32>
    %22 = arith.cmpi slt, %20, %21 : vector<8x16xi32>
    %c4_i32_17 = arith.constant 4 : i32
    %23 = vector.broadcast %c4_i32_17 : i32 to vector<8x16xi32>
    %24 = arith.cmpi sge, %20, %23 : vector<8x16xi32>
    %c8_i32 = arith.constant 8 : i32
    %25 = vector.broadcast %c8_i32 : i32 to vector<8x16xi32>
    %26 = arith.cmpi slt, %20, %25 : vector<8x16xi32>
    %27 = arith.andi %24, %26 : vector<8x16xi1>
    %cst_18 = arith.constant 2.000000e+01 : f32
    %28 = vector.broadcast %cst_18 : f32 to vector<8x16xf32>
    %29 = arith.cmpf ogt, %19, %28 : vector<8x16xf32>
    %cst_19 = arith.constant 2.000000e+01 : f32
    %30 = vector.broadcast %cst_19 : f32 to vector<8x16xf32>
    %31 = arith.minimumf %19, %30 : vector<8x16xf32>
    %32 = math.exp %31 : vector<8x16xf32>
    %33 = math.log1p %32 : vector<8x16xf32>
    %34 = arith.select %29, %19, %33 : vector<8x16xi1>, vector<8x16xf32>
    %35 = math.tanh %19 : vector<8x16xf32>
    %36 = arith.select %27, %34, %19 : vector<8x16xi1>, vector<8x16xf32>
    %37 = arith.select %22, %35, %36 : vector<8x16xi1>, vector<8x16xf32>
    %c0_20 = arith.constant 0 : index
    %c0_21 = arith.constant 0 : index
    %38 = vector.load %arg8[%c0_20, %c0_21] : memref<8x16xf32, #tpu.memory_space<vmem>>, vector<8x16xf32>
    tpu.vector_store %arg8[%c0_20, %c0_21], %37 {strides = array<i32>} : memref<8x16xf32, #tpu.memory_space<vmem>>, vector<8x16xf32>,
    return
  }
  func.func @transform_0(%arg0: i32) -> (i32, i32) {
    %c0_i32 = arith.constant 0 : i32
    %c0_i32_0 = arith.constant 0 : i32
    return %arg0, %c0_i32 : i32, i32
  }
  func.func @transform_1(%arg0: i32) -> (i32, i32) {
    %c0_i32 = arith.constant 0 : i32
    %c0_i32_0 = arith.constant 0 : i32
    %c0_i32_1 = arith.constant 0 : i32
    return %c0_i32, %c0_i32_0 : i32, i32
  }
  func.func @transform_2(%arg0: i32) -> (i32, i32) {
    %c0_i32 = arith.constant 0 : i32
    %c0_i32_0 = arith.constant 0 : i32
    %c0_i32_1 = arith.constant 0 : i32
    return %c0_i32, %c0_i32_0 : i32, i32
  }
  func.func @transform_3(%arg0: i32) -> (i32, i32) {
    %c0_i32 = arith.constant 0 : i32
    %c0_i32_0 = arith.constant 0 : i32
    %c0_i32_1 = arith.constant 0 : i32
    return %c0_i32, %c0_i32_0 : i32, i32
  }
  func.func @transform_4(%arg0: i32) -> (i32, i32) {
    %c0_i32 = arith.constant 0 : i32
    %c0_i32_0 = arith.constant 0 : i32
    %c0_i32_1 = arith.constant 0 : i32
    return %c0_i32, %c0_i32_0 : i32, i32
  }
  func.func @transform_5(%arg0: i32) -> (i32, i32) {
    %c0_i32 = arith.constant 0 : i32
    %c0_i32_0 = arith.constant 0 : i32
    %c0_i32_1 = arith.constant 0 : i32
    return %c0_i32, %c0_i32_0 : i32, i32
  }
  func.func @transform_6(%arg0: i32) -> (i32, i32) {
    %c0_i32 = arith.constant 0 : i32
    %c0_i32_0 = arith.constant 0 : i32
    %c0_i32_1 = arith.constant 0 : i32
    return %c0_i32, %c0_i32_0 : i32, i32
  }
  func.func @transform_7(%arg0: i32) -> (i32, i32) {
    %c0_i32 = arith.constant 0 : i32
    %c0_i32_0 = arith.constant 0 : i32
    return %arg0, %c0_i32 : i32, i32
  }
}

</mosaic_0001>

<bundles_post_ra>
// kernel: ppo_forward.1
= control target key start
LH: loop header
LB: loop body
LE: loop exit
PB: predicated region body
PF: predicated region fallthrough
CT: control target
= control target key end

     0   :  { %v393_v0 = vmov 0.0|0.0   ;;  %vm394_vm0 = vmmov 0   ;;  %v395_v3 = vmov 0.0   ;;  %vm36_vm1 = vcmask 130048   ;;  %s492_s1 = inlined_call_operand.vmem [shape: f32[16,32], index: 1, kind: input, shape index: {}]   ;;  %s493_s3 = inlined_call_operand.vmem [shape: f32[32,48], index: 3, kind: input, shape index: {}]   ;;  %s494_s0 = inlined_call_operand.vmem [shape: f32[8,16], index: 0, kind: input, shape index: {}]   ;;  %s495_s5 = inlined_call_operand.vmem [shape: f32[48,16], index: 5, kind: input, shape index: {}]   ;;  %s496_s2 = inlined_call_operand.vmem [shape: f32[1,32], index: 2, kind: input, shape index: {}]   ;;  %s497_s4 = inlined_call_operand.vmem [shape: f32[1,48], index: 4, kind: input, shape index: {}]   ;;  %s498_s6 = inlined_call_operand.vmem [shape: f32[1,16], index: 6, kind: input, shape index: {}]   ;;  %s499_s7 = inlined_call_operand.vmem [shape: f32[8,16], index: 7, kind: output, shape index: {}]  }
   0x1   :  { %366 = vmatprep.subr.bf16.mxu1 %v393_v0  ;;  %v27_v1 = vld [vmem:[%s492_s1] sm:$0xff]  ;;  %v28_v2 = vld [vmem:[%s492_s1 + $0x8] sm:$0xff]  ;;  %337 = vmatprep.mubr.msk.f32.mxu1 %vm394_vm0, %v395_v3  ;;  %v113_v9 = vld [vmem:[%s493_s3 + $0x10] sm:$0xff]  ;;  %vm122_vm2 = vcmask 261120   ;;  %vm210_vm3 = vcmask 392192   ;;  %v284_v39 = vlaneseq }
   0x2   :  { %v367_v4 = vpack.c.bf16 %v28_v2, %v27_v1  ;;  %v111_v5 = vld [vmem:[%s493_s3] sm:$0xff]  ;;  %v112_v6 = vld [vmem:[%s493_s3 + $0x8] sm:$0xff]  ;;  %375 = vmatprep.subr.bf16.mxu0 %v393_v0  ;;  %363 = vmatprep.mubr.msk.f32.mxu0 %vm394_vm0, %v395_v3  ;;  %v114_v10 = vld [vmem:[%s493_s3 + $0x18] sm:$0xff] }
   0x3   :  { %v26_v7 = vld [vmem:[%s494_s0] sm:$0xff]  ;;  %v370_v8 = vpack.c.bf16 %v112_v6, %v111_v5  ;;  %v373_v11 = vpack.c.bf16 %v114_v10, %v113_v9  ;;  %v198_v13 = vld [vmem:[%s495_s5 + $0x8] sm:$0xff]  ;;  %v199_v14 = vld [vmem:[%s495_s5 + $0x10] sm:$0xff]  ;;  %v285_v41 = vand.u32 127, %v284_v39 }
   0x4   :  { %368 = vmatpush3.bf16.msra.mxu1 %v367_v4  ;;  %v197_v12 = vld [vmem:[%s495_s5] sm:$0xff]  ;;  %v200_v16 = vld [vmem:[%s495_s5 + $0x18] sm:$0xff]  ;;  %v202_v24 = vld [vmem:[%s495_s5 + $0x28] sm:$0xff] }
   0x5   :  { %369 = vmatprep.subr.bf16.mxu1 %v393_v0  ;;  %v376_v15 = vpack.c.bf16 %v198_v13, %v197_v12  ;;  %v379_v17 = vpack.c.bf16 %v200_v16, %v199_v14  ;;  %v312_v18 = vld [vmem:[%s496_s2] ss:$0 sm:$0xff]  ;;  %vm287_vm4 = vcmp.ge.s32.totalorder %v285_v41, 4  ;;  %vm288_vm5 = vcmp.lt.s32.totalorder %v285_v41, 8 }
   0x6   :  { %v201_v23 = vld [vmem:[%s495_s5 + $0x20] sm:$0xff]  ;;  %vm289_vm6 = vmand %vm287_vm4, %vm288_vm5  ;;  %vm286_vm8 = vcmp.lt.s32.totalorder %v285_v41, 4 }
   0x7   :  { %338 = vmatmul.mubr.msk.f32.vlgmr.msra.gmra.mrb[0].mxu1 %vm36_vm1, %v26_v7  ;;  %377 = vmatpush3.bf16.msra.mxu0 %v376_v15  ;;  %v382_v25 = vpack.c.bf16 %v202_v24, %v201_v23  ;;  %v314_v26 = vld [vmem:[%s497_s4] ss:$0 sm:$0xff] }
   0x8   :  { %371 = vmatpush3.bf16.msra.mxu1 %v370_v8  ;;  %348 = vmatprep.mubr.msk.f32.mxu1 %vm394_vm0, %v395_v3  ;;  %v316_v31 = vld [vmem:[%s498_s6] ss:$0 sm:$0xff] }
   0x9   :  { %372 = vmatprep.subr.bf16.mxu1 %v393_v0  ;;  %378 = vmatprep.subr.bf16.mxu0 %v393_v0 }
   0xb   :  { %380 = vmatpush3.bf16.msra.mxu0 %v379_v17 }
   0xc   :  { %374 = vmatpush3.bf16.msra.mxu1 %v373_v11  ;;  %381 = vmatprep.subr.bf16.mxu0 %v393_v0 }
   0xf   :  { %383 = vmatpush3.bf16.msra.mxu0 %v382_v25 }
  0xda   :  { %v106_v19 = vpop.f32.mrb[0].mxu1 }
  0xdb   :  { %v107_v20 = vadd.f32 %v312_v18, %v106_v19  ;;  %v339_v21 = vpop.f32.mrb[1].mxu1 }
  0xdd   :  { %v110_v22 = vmax.f32 %v107_v20, 0.0 }
  0xdf   :  { %349 = vmatmul.mubr.msk.f32.vlgmr.msra.gmra.mrb[2].mxu1 %vm122_vm2, %v110_v22 }
 0x1b2   :  { %v192_v27 = vpop.f32.mrb[2].mxu1 }
 0x1b3   :  { %v193_v28 = vadd.f32 %v314_v26, %v192_v27  ;;  %v350_v29 = vpop.f32.mrb[3].mxu1 }
 0x1b5   :  { %v196_v30 = vmax.f32 %v193_v28, 0.0 }
 0x1b7   :  { %364 = vmatmul.mubr.msk.f32.vlgmr.msra.gmra.mrb[0].mxu0 %vm210_vm3, %v196_v30 }
 0x28a   :  { %v280_v32 = vpop.f32.mrb[0].mxu0 }
 0x28b   :  { %v281_v33 = vadd.f32 %v316_v31, %v280_v32  ;;  %v365_v34 = vpop.f32.mrb[1].mxu0 }
 0x28d   :  { %v291_v35 = vmin.f32 %v281_v33, 20.0  ;;  %vm290_vm9 = vcmp.gt.f32.partialorder %v281_v33, 20.0 }
 0x28f   :  { %v292_v36 = vmul.f32 1.442695, %v291_v35 }
 0x291   :  { %387 = vpow2.f32 %v292_v36 }
 0x29b   :  { %v388_v37 = vpop.eup %387 }
 0x29c   :  { %v294_v38 = vadd.f32 1.0, %v388_v37  ;;  %v297_v40 = vmul.f32 -0.5, %v388_v37  ;;  %v300_v43 = vand.u32 2147483647, %v388_v37 }
 0x29e   :  { %389 = vlog2.f32 %v294_v38  ;;  %v298_v42 = vadd.f32 1.0, %v297_v40  ;;  %vm301_vm7 = vcmp.lt.f32.partialorder %v300_v43, 0.0004427343 }
 0x29f   :  { %391 = vtanh.f32 %v281_v33 }
 0x2a0   :  { %v299_v46 = vmul.f32 %v388_v37, %v298_v42 }
 0x2a8   :  { %v390_v44 = vpop.eup %389 }
 0x2a9   :  { %v296_v45 = vmul.f32 0.6931472, %v390_v44  ;;  %v392_v49 = vpop.eup %391 }
 0x2ab   :  { %v302_v47 = vsel %vm301_vm7, %v299_v46, %v296_v45 }
 0x2ac   :  { %v303_v48 = vsel %vm290_vm9, %v281_v33, %v302_v47 }
 0x2ad   :  { %v305_v50 = vsel %vm289_vm6, %v303_v48, %v281_v33 }
 0x2ae   :  { %v306_v51 = vsel %vm286_vm8, %v392_v49, %v305_v50 }
 0x2af   :  { %307 = vst.msk [vmem:[%s499_s7] sm:$0xff] %vm36_vm1, %v306_v51 }

</bundles_post_ra>
